<compile_context>
chip_gen: v7x
topology: tpu7x:2x2x1
jax: 0.10.0
libtpu: 0.0.40
codegen_flags: <defaults>
</compile_context>

<pallas_src>
import jax
import jax.numpy as jnp
from jax import lax
from jax.experimental import pallas as pl
from jax.experimental.pallas import tpu as pltpu

BN_EPS = 1e-5


def context_gating_kernel(x_ref, w_ref, gamma_ref, beta_ref, o_ref, *scratch):
    """One (j, k) grid step.

    j tiles the output-feature axis ("parallel"), k tiles the Linear
    contraction axis ("arbitrary", innermost).  The f32 accumulator is the
    output block itself when the output dtype is f32, else a VMEM scratch.
    x_ref is the full (B, D) batch, resident in VMEM across the whole grid.
    """
    acc_ref = scratch[0] if scratch else o_ref
    tn, tk = w_ref.shape                     # weight block is (tn out, tk in)
    j = pl.program_id(0)
    k = pl.program_id(1)

    @pl.when(k == 0)
    def _init():
        acc_ref[...] = jnp.zeros_like(acc_ref)

    # Linear: accumulate x[:, k-tile] @ W[j-tile, k-tile]^T on the MXU.
    # Weight stays in its native (D_out, D_in) layout; contraction on dim 1 of
    # both operands; inputs stay in their native dtype, accumulation in f32.
    xk = x_ref[:, pl.ds(pl.multiple_of(k * tk, tk), tk)]
    acc_ref[...] += lax.dot_general(
        xk, w_ref[...],
        dimension_numbers=(((1,), (1,)), ((), ())),
        preferred_element_type=jnp.float32)

    @pl.when(k == pl.num_programs(1) - 1)
    def _finalize():
        x1 = acc_ref[...].astype(jnp.float32)                   # (B, tn) f32
        inv_b = 1.0 / x1.shape[0]

        # Training-mode BatchNorm1d, biased variance, centered two-pass form
        # (x1 is already resident in f32, so the extra pass is VPU-cheap).
        # The Linear bias was dropped in the wrapper: it cancels exactly under
        # the batch-mean subtraction.
        mean = jnp.sum(x1, axis=0, keepdims=True) * inv_b            # (1, tn)
        centered = x1 - mean
        var = jnp.sum(centered * centered, axis=0, keepdims=True) * inv_b
        scale = gamma_ref[...].astype(jnp.float32) * lax.rsqrt(var + BN_EPS)
        x1n = centered * scale + beta_ref[...].astype(jnp.float32)

        # GLU(cat([x, x1], dim=1), dim=1) == x * sigmoid(x1); single fused,
        # lane-dense store of the (B, tn) output block.
        xg = x_ref[:, pl.ds(pl.multiple_of(j * tn, tn), tn)].astype(jnp.float32)
        o_ref[...] = (xg * jax.nn.sigmoid(x1n)).astype(o_ref.dtype)


def _vmem_estimate(B, D, tn, tk, x_isz, w_isz, o_isz, use_scratch):
    x_resident = 2 * B * D * x_isz          # resident batch (conservatively x2)
    w_tiles = 2 * tn * tk * w_isz           # double-buffered weight stream
    out_tiles = 2 * B * tn * o_isz
    params = 2 * 2 * tn * 4                 # gamma / beta tiles
    acc = B * tn * 4 if use_scratch else 0
    return x_resident + w_tiles + out_tiles + params + acc


def _pick_tiles(B, D, x_isz, w_isz, o_isz, use_scratch):
    # tn: prefer 256-multiples (fills the 256-wide MXU on v6e/v7x, lane-dense
    # stores) but keep >= 2 j-tiles so the "parallel" axis can shard over
    # v7x's two TensorCores.
    tn = None
    for t in (512, 256, 128):
        if D % t == 0 and D // t >= 2:
            tn = t
            break
    if tn is None:
        for t in (512, 256, 128):
            if D % t == 0:
                tn = t
                break
    if tn is None:
        tn = D
    # tk: as large as the (v7x-safe) VMEM budget allows.
    tk_opts = [t for t in (2048, 1024, 512, 256, 128) if D % t == 0] or [D]
    budget = 48 << 20
    tk = tk_opts[-1]
    for t in tk_opts:
        if _vmem_estimate(B, D, tn, t, x_isz, w_isz, o_isz, use_scratch) <= budget:
            tk = t
            break
    return tn, tk


def context_gating(x, weight, bias, gamma, beta, *, tn=None, tk=None):
    """x: (B, D); weight: (D_out, D_in) native PyTorch layout; bias/gamma/beta: (D,).

    `bias` is accepted for signature parity with nn.Linear but not used: under
    training-mode BatchNorm it is cancelled exactly by the mean subtraction.
    The weight is streamed at its own dtype (pass bf16 params to halve the
    HBM-bound weight traffic); accumulation is always f32.
    """
    del bias
    B, D = x.shape
    assert weight.shape == (D, D)

    out_dtype = x.dtype
    x_isz = x.dtype.itemsize
    w_isz = weight.dtype.itemsize
    o_isz = jnp.dtype(out_dtype).itemsize
    acc_in_out = out_dtype == jnp.float32        # accumulate directly in o_ref
    use_scratch = not acc_in_out

    auto_tn, auto_tk = _pick_tiles(B, D, x_isz, w_isz, o_isz, use_scratch)
    tn = auto_tn if tn is None else tn
    tk = auto_tk if tk is None else tk
    assert D % tn == 0 and D % tk == 0, "feature dim must divide tile sizes"

    g2 = gamma.reshape(1, D).astype(jnp.float32)
    b2 = beta.reshape(1, D).astype(jnp.float32)

    grid = (D // tn, D // tk)   # (feature tiles: parallel, K tiles: arbitrary)

    est = _vmem_estimate(B, D, tn, tk, x_isz, w_isz, o_isz, use_scratch)
    vmem_limit = int(min(max(est + (8 << 20), 32 << 20), 48 << 20))
    vmem_limit = max(vmem_limit, est + (2 << 20))

    cost = pl.CostEstimate(
        flops=2 * B * D * D,
        transcendentals=B * D,
        bytes_accessed=D * D * w_isz + B * D * x_isz + B * D * o_isz + 2 * D * 4,
    )

    scratch_shapes = [] if acc_in_out else [pltpu.VMEM((B, tn), jnp.float32)]

    return pl.pallas_call(
        context_gating_kernel,
        out_shape=jax.ShapeDtypeStruct((B, D), out_dtype),
        grid_spec=pltpu.PrefetchScalarGridSpec(
            num_scalar_prefetch=0,
            grid=grid,
            in_specs=[
                pl.BlockSpec((B, D), lambda j, k: (0, 0)),    # x: resident, both views
                pl.BlockSpec((tn, tk), lambda j, k: (j, k)),  # weight, native layout
                pl.BlockSpec((1, tn), lambda j, k: (0, j)),   # gamma (resident over k)
                pl.BlockSpec((1, tn), lambda j, k: (0, j)),   # beta  (resident over k)
            ],
            out_specs=pl.BlockSpec((B, tn), lambda j, k: (0, j)),
            scratch_shapes=scratch_shapes,
        ),
        compiler_params=pltpu.CompilerParams(
            dimension_semantics=("parallel", "arbitrary"),
            vmem_limit_bytes=vmem_limit,
        ),
        cost_estimate=cost,
    )(x, weight, g2, b2)


def reference(x, weight, bias, gamma, beta):
    x1 = x @ weight.T + bias
    mean = jnp.mean(x1, axis=0, keepdims=True)
    var = jnp.mean((x1 - mean) ** 2, axis=0, keepdims=True)
    x1 = (x1 - mean) / jnp.sqrt(var + BN_EPS) * gamma + beta
    return x * jax.nn.sigmoid(x1)


if __name__ == "__main__":
    B, D = 8, 256                     # small shapes; picker -> tn=128, tk=256, grid (2, 1)
    key = jax.random.PRNGKey(0)
    kx, kw, kb, kg, kbe = jax.random.split(key, 5)

    x = jax.random.normal(kx, (B, D), dtype=jnp.float32)
    bound = 1.0 / (D ** 0.5)
    weight = jax.random.uniform(kw, (D, D), dtype=jnp.float32,
                                minval=-bound, maxval=bound)
    bias = jax.random.uniform(kb, (D,), dtype=jnp.float32,
                              minval=-bound, maxval=bound)
    gamma = jnp.ones((D,), dtype=jnp.float32) + 0.01 * jax.random.normal(kg, (D,))
    beta = 0.01 * jax.random.normal(kbe, (D,))

    ref = reference(x, weight, bias, gamma, beta)

    # f32 path (accumulator lives in the output block, no scratch).
    out = context_gating(x, weight, bias, gamma, beta)
    out = jax.block_until_ready(out)
    assert out.shape == (B, D)
    assert jnp.allclose(out, ref, atol=5e-5, rtol=5e-5), "f32 mismatch vs reference"

    # bf16 parameter/activation streaming path (scratch accumulator, halves the
    # HBM-bound weight traffic); looser tolerance vs the f32 reference.
    out_bf16 = context_gating(x.astype(jnp.bfloat16), weight.astype(jnp.bfloat16),
                              bias, gamma, beta)
    out_bf16 = jax.block_until_ready(out_bf16)
    assert out_bf16.shape == (B, D)
    assert jnp.allclose(out_bf16.astype(jnp.float32), ref, atol=6e-2, rtol=6e-2), \
        "bf16 mismatch vs reference"

    print("KERNEL_OK")
</pallas_src>

<mosaic_0001>
module attributes {stable_mosaic.version = 11 : i64} {
  func.func @context_gating_kernel(%arg0: i32, %arg1: i32, %arg2: memref<8x256xf32, #tpu.memory_space<vmem>>, %arg3: memref<128x256xf32, #tpu.memory_space<vmem>>, %arg4: memref<1x128xf32, #tpu.memory_space<vmem>>, %arg5: memref<1x128xf32, #tpu.memory_space<vmem>>, %arg6: memref<8x128xf32, #tpu.memory_space<vmem>>) attributes {dimension_semantics = [#tpu.dimension_semantics<parallel>, #tpu.dimension_semantics<arbitrary>], iteration_bounds = array<i64: 2, 1>, scalar_prefetch = 0 : i64, scratch_operands = 0 : i64, tpu.core_type = #tpu.core_type<tc>, window_params = [{pipeline_mode = #tpu.pipeline_mode<synchronous>, transform_indices = @transform_0, window_bounds = array<i64: 8, 256>}, {transform_indices = @transform_1, window_bounds = array<i64: 128, 256>}, {transform_indices = @transform_2, window_bounds = array<i64: 1, 128>}, {transform_indices = @transform_3, window_bounds = array<i64: 1, 128>}, {transform_indices = @transform_4, window_bounds = array<i64: 8, 128>}]} {
    %c0_i32 = arith.constant 0 : i32
    %0 = arith.cmpi eq, %arg1, %c0_i32 : i32
    %1 = arith.extui %0 : i1 to i32
    %c0_i32_0 = arith.constant 0 : i32
    %2 = arith.cmpi ne, %1, %c0_i32_0 : i32
    scf.if %2 {
      %cst_9 = arith.constant 0.000000e+00 : f32
      %15 = vector.broadcast %cst_9 : f32 to vector<8x128xf32>
      %c0_10 = arith.constant 0 : index
      %c0_11 = arith.constant 0 : index
      %16 = vector.load %arg6[%c0_10, %c0_11] : memref<8x128xf32, #tpu.memory_space<vmem>>, vector<8x128xf32>
      tpu.vector_store %arg6[%c0_10, %c0_11], %15 {strides = array<i32>} : memref<8x128xf32, #tpu.memory_space<vmem>>, vector<8x128xf32>,
    } else {
    }
    %c256_i32 = arith.constant 256 : i32
    %3 = arith.muli %arg1, %c256_i32 : i32
    %4 = tpu.assume_multiple %3, 256 : i32
    %c0 = arith.constant 0 : index
    %5 = arith.index_cast %4 : i32 to index
    %6 = vector.load %arg2[%c0, %5] : memref<8x256xf32, #tpu.memory_space<vmem>>, vector<8x256xf32>
    %c0_1 = arith.constant 0 : index
    %c0_2 = arith.constant 0 : index
    %7 = vector.load %arg6[%c0_1, %c0_2] : memref<8x128xf32, #tpu.memory_space<vmem>>, vector<8x128xf32>
    %c0_3 = arith.constant 0 : index
    %c0_4 = arith.constant 0 : index
    %8 = vector.load %arg3[%c0_3, %c0_4] : memref<128x256xf32, #tpu.memory_space<vmem>>, vector<128x256xf32>
    %cst = arith.constant dense<0.000000e+00> : vector<8x128xf32>
    %9 = tpu.matmul %6, %8, %cst {dimension_numbers = #tpu.dot_dimension_numbers<[1], [1], [0], [0], [0, 0, 1, 0], [], []>} : vector<8x256xf32>, vector<128x256xf32>, vector<8x128xf32> -> vector<8x128xf32>
    %10 = arith.addf %7, %9 : vector<8x128xf32>
    %c0_5 = arith.constant 0 : index
    %c0_6 = arith.constant 0 : index
    %11 = vector.load %arg6[%c0_5, %c0_6] : memref<8x128xf32, #tpu.memory_space<vmem>>, vector<8x128xf32>
    tpu.vector_store %arg6[%c0_5, %c0_6], %10 {strides = array<i32>} : memref<8x128xf32, #tpu.memory_space<vmem>>, vector<8x128xf32>,
    %c0_i32_7 = arith.constant 0 : i32
    %12 = arith.cmpi eq, %arg1, %c0_i32_7 : i32
    %13 = arith.extui %12 : i1 to i32
    %c0_i32_8 = arith.constant 0 : i32
    %14 = arith.cmpi ne, %13, %c0_i32_8 : i32
    scf.if %14 {
      %c0_9 = arith.constant 0 : index
      %c0_10 = arith.constant 0 : index
      %15 = vector.load %arg6[%c0_9, %c0_10] : memref<8x128xf32, #tpu.memory_space<vmem>>, vector<8x128xf32>
      %cst_11 = arith.constant dense<0.000000e+00> : vector<128xf32>
      %16 = vector.multi_reduction <add>, %15, %cst_11 [0] : vector<8x128xf32> to vector<128xf32>
      %17 = vector.shape_cast %16 : vector<128xf32> to vector<1x128xf32>
      %cst_12 = arith.constant 1.250000e-01 : f32
      %18 = vector.broadcast %cst_12 : f32 to vector<1x128xf32>
      %19 = arith.mulf %17, %18 : vector<1x128xf32>
      %20 = vector.broadcast %19 : vector<1x128xf32> to vector<8x128xf32>
      %21 = arith.subf %15, %20 : vector<8x128xf32>
      %22 = arith.mulf %21, %21 : vector<8x128xf32>
      %cst_13 = arith.constant dense<0.000000e+00> : vector<128xf32>
      %23 = vector.multi_reduction <add>, %22, %cst_13 [0] : vector<8x128xf32> to vector<128xf32>
      %24 = vector.shape_cast %23 : vector<128xf32> to vector<1x128xf32>
      %cst_14 = arith.constant 1.250000e-01 : f32
      %25 = vector.broadcast %cst_14 : f32 to vector<1x128xf32>
      %26 = arith.mulf %24, %25 : vector<1x128xf32>
      %c0_15 = arith.constant 0 : index
      %c0_16 = arith.constant 0 : index
      %27 = vector.load %arg4[%c0_15, %c0_16] : memref<1x128xf32, #tpu.memory_space<vmem>>, vector<1x128xf32>
      %cst_17 = arith.constant 9.99999974E-6 : f32
      %28 = vector.broadcast %cst_17 : f32 to vector<1x128xf32>
      %29 = arith.addf %26, %28 : vector<1x128xf32>
      %30 = math.rsqrt %29 : vector<1x128xf32>
      %31 = arith.mulf %27, %30 : vector<1x128xf32>
      %32 = vector.broadcast %31 : vector<1x128xf32> to vector<8x128xf32>
      %33 = arith.mulf %21, %32 : vector<8x128xf32>
      %c0_18 = arith.constant 0 : index
      %c0_19 = arith.constant 0 : index
      %34 = vector.load %arg5[%c0_18, %c0_19] : memref<1x128xf32, #tpu.memory_space<vmem>>, vector<1x128xf32>
      %35 = vector.broadcast %34 : vector<1x128xf32> to vector<8x128xf32>
      %36 = arith.addf %33, %35 : vector<8x128xf32>
      %c128_i32 = arith.constant 128 : i32
      %37 = arith.muli %arg0, %c128_i32 : i32
      %38 = tpu.assume_multiple %37, 128 : i32
      %c0_20 = arith.constant 0 : index
      %39 = arith.index_cast %38 : i32 to index
      %40 = vector.load %arg2[%c0_20, %39] : memref<8x256xf32, #tpu.memory_space<vmem>>, vector<8x128xf32>
      %41 = arith.negf %36 : vector<8x128xf32>
      %42 = math.exp %41 : vector<8x128xf32>
      %cst_21 = arith.constant 1.000000e+00 : f32
      %43 = vector.broadcast %cst_21 : f32 to vector<8x128xf32>
      %44 = arith.addf %43, %42 : vector<8x128xf32>
      %45 = arith.divf %43, %44 : vector<8x128xf32>
      %46 = arith.mulf %40, %45 : vector<8x128xf32>
      %c0_22 = arith.constant 0 : index
      %c0_23 = arith.constant 0 : index
      %47 = vector.load %arg6[%c0_22, %c0_23] : memref<8x128xf32, #tpu.memory_space<vmem>>, vector<8x128xf32>
      tpu.vector_store %arg6[%c0_22, %c0_23], %46 {strides = array<i32>} : memref<8x128xf32, #tpu.memory_space<vmem>>, vector<8x128xf32>,
    } else {
    }
    return
  }
  func.func @transform_0(%arg0: i32, %arg1: i32) -> (i32, i32) {
    %c0_i32 = arith.constant 0 : i32
    %c0_i32_0 = arith.constant 0 : i32
    %c0_i32_1 = arith.constant 0 : i32
    return %c0_i32, %c0_i32_0 : i32, i32
  }
  func.func @transform_1(%arg0: i32, %arg1: i32) -> (i32, i32) {
    %c0_i32 = arith.constant 0 : i32
    return %arg0, %arg1 : i32, i32
  }
  func.func @transform_2(%arg0: i32, %arg1: i32) -> (i32, i32) {
    %c0_i32 = arith.constant 0 : i32
    %c0_i32_0 = arith.constant 0 : i32
    return %c0_i32, %arg0 : i32, i32
  }
  func.func @transform_3(%arg0: i32, %arg1: i32) -> (i32, i32) {
    %c0_i32 = arith.constant 0 : i32
    %c0_i32_0 = arith.constant 0 : i32
    return %c0_i32, %arg0 : i32, i32
  }
  func.func @transform_4(%arg0: i32, %arg1: i32) -> (i32, i32) {
    %c0_i32 = arith.constant 0 : i32
    %c0_i32_0 = arith.constant 0 : i32
    return %c0_i32, %arg0 : i32, i32
  }
}

</mosaic_0001>

<bundles_post_ra>
// kernel: tpu_custom_call.1
= control target key start
LH: loop header
LB: loop body
LE: loop exit
PB: predicated region body
PF: predicated region fallthrough
CT: control target
= control target key end

     0   :  { %9 = vsyncpa [#allocation3], 0  ;;  %s1150_s0 = inlined_call_operand.hbm [shape: f32[8,256], index: 0, kind: input, shape index: {}]   ;;  %s1151_s1 = inlined_call_operand.hbm [shape: f32[256,256], index: 1, kind: input, shape index: {}]   ;;  %s1152_s2 = inlined_call_operand.vmem [shape: f32[1,256], index: 2, kind: input, shape index: {}]   ;;  %s1153_s3 = inlined_call_operand.vmem [shape: f32[1,256], index: 3, kind: input, shape index: {}]   ;;  %s1154_s4 = inlined_call_operand.hbm [shape: f32[8,256], index: 4, kind: output, shape index: {}]  }
   0x1   :  { %10 = vsyncpa [#allocation6], 0 }
   0x2   :  { %12 = vsyncpa [#allocation6 + $0x1], 0 }
   0x3   :  { %13 = vsyncpa [#allocation4], 0 }
   0x4   :  { %15 = vsyncpa [#allocation4 + $0x1], 0  ;;  %s888_s15 = smov 0   ;;  %s890_s16 = smov 0  }
   0x5   :  { %s892_s17 = smov 0   ;;  %s894_s18 = smov 0  }
   0x6   :  { %s896_s19 = smov 0   ;;  %s898_s20 = smov 0  }
   0x7 LB: > { %s575_s21 = sadd.s32 4294967295, %s856_s20   ;;  %s576_s22 = sadd.s32 4294967294, %s856_s20   ;;  %s856_s20 = sphi %s898_s20, %s21_s20   ;;  %s852_s19 = sphi %s896_s19, %s1182_s19   ;;  %s848_s18 = sphi %s894_s18, %s1181_s18   ;;  %s844_s17 = sphi %s892_s17, %s1180_s17   ;;  %s840_s16 = sphi %s890_s16, %s1179_s16   ;;  %s836_s15 = sphi %s888_s15, %s1178_s15  }
   0x8   : > { %s63_s23 = sadd.s32 1, %s844_s17  ;;  %p70_p0 = scmp.ne.s32.totalorder %s844_s17, %s840_s16 }
   0x9   : > { %p71_p1 = scmp.eq.s32.totalorder %s856_s20, 0  ;;  %p76_p2 = scmp.ne.s32.totalorder %s840_s16, %s836_s15 }
   0xa   : > { %p926_p3 = scmp.eq.s32.totalorder %s575_s21, 0  ;;  %p152_p4 = scmp.eq.s32.totalorder %s575_s21, 1 }
   0xb   : > { %p930_p5 = por %p71_p1, %p70_p0  ;;  %p158_p6 = scmp.eq.s32.totalorder %s576_s22, 1 }
   0xc   : > { %s1161_s24 = scalar_select %p926_p3, 1, 0 }
   0xd   : > { %p936_p7 = por %p926_p3, %p76_p2  ;;  %p940_p8 = por %p152_p4, %p70_p0 }
   0xe   : > { %p944_p9 = por %p158_p6, %p76_p2  ;;  %p577_p10 = scmp.ge.s32.totalorder %s856_s20, 1 }
   0xf   : > { %s1163_s26 = scalar_select %p936_p7, 1, 0 }
  0x10   : > { %s1164_s27 = scalar_select %p940_p8, 1, 0 }
  0x11   : > { %s1165_s28 = scalar_select %p944_p9, 1, 0 }
  0x12   : > { %p165_p11 = scmp.lt.s32.totalorder %s856_s20, 3  ;;  %s858_s30 = smov [#allocation2]  }
  0x13   : > { %s178_s5 = sshll.u32 %s858_s30, 4  ;;  %p651_p1 = scmp.lt.s32.totalorder %s856_s20, 2  ;;  %s179_s5 = int_to_ptr.vmem [resolvable:$true] %s178_s5 }
  0x14   : > { %p951_p13 = pnand %p577_p10, %p165_p11  ;;  %s33_s8 = sadd.s32 1, %s852_s19 }
  0x15   : > { %p960_p4 = pnand %p651_p1, %p930_p5  ;;  %p971_p6 = scmp.ge.s32.totalorder %s33_s8, 2 }
  0x16   : > { %s1166_s29 = scalar_select %p951_p13, 1, 0 }
  0x17   : > { %p638_p0 = pneg %p951_p13  ;;  %s189_s10 = sand.u32 1, %s844_s17  }
  0x18   : > { %s1167_s6 = scalar_select %p960_p4, 1, 0 }
  0x19   : > { %p966_p2 = pnand %p638_p0, %p926_p3  ;;  %s712_s13 = scalar_lea.hbm %s1150_s0, 256 }
  0x1a   : > { %s1169_s9 = scalar_select %p971_p6, 1, 0 }
  0x1b   : > { %p713_p5 = scmp.ne.s32.totalorder %s1150_s0, %s712_s13  ;;  %p714_p10 = pneg %p966_p2 }
  0x1c   : > { %p719_p0 = scmp.lt.u32.totalorder %s712_s13, %s1150_s0 }
  0x1d   : > { %p715_p11 = pnand %p714_p10, %p713_p5 }
  0x1f   : > { %p716_p1 = pneg %p715_p11 }
  0x21   : > { %p721_p12 = pnand %p719_p0, %p716_p1 }
  0x23   : > { %724 = shalt.err (!%p721_p12)
}
  0x24   : > { %s725_s30 = scalar_lea.vmem %s179_s5, 256  ;;  %p733_p3 = scmp.lt.s32.totalorder %s179_s5, %s179_s5 }
  0x25   : > { %p726_p9 = scmp.ne.s32.totalorder %s179_s5, %s725_s30  ;;  %p734_p13 = scmp.lt.s32.totalorder %s725_s30, %s725_s30 }
  0x27   : > { %p728_p8 = pnand %p726_p9, %p714_p10  ;;  %p735_p4 = por %p734_p13, %p733_p3 }
  0x29   : > { %p729_p7 = pneg %p728_p8 }
  0x2b   : > { %p736_p6 = pnand %p735_p4, %p729_p7 }
  0x2d   : > { %739 = shalt.err (!%p736_p6)
}
  0x2e   : > { %641 = dma.hbm_to_vmem [thread:$0]  (!%p966_p2), %s1150_s0, 256, %s179_s5, [#allocation3]  }
  0x2f   : > { %p1170_p9 = scmp.ne.s32.totalorder %s1169_s9, 0  ;;  %s580_s13 = sshll.u32 %s189_s10, 8 }
  0x30   : > { %s597_s21 = sshll.u32 %s852_s19, 12  ;;  %s193_s30 = scalar_lea.vmem [#allocation5], %s580_s13 }
  0x31   : > { %s1184_s8 = smov (%p1170_p9, %s33_s8), 0  ;;  %s1002_s25 = scalar_lea.hbm %s1151_s1, %s597_s21 }
  0x32   : > { %s58_s14 = ssub.s32 %s852_s19, %s1184_s8  ;;  %s203_s11 = sshll.u32 %s193_s30, 4  ;;  %s1009_s11 = int_to_ptr.vmem [resolvable:$true] %s203_s11 }
  0x33   : > { %p61_p3 = scmp.eq.s32.totalorder %s58_s14, 0  ;;  %s1011_s9 = scalar_lea.sflag [#allocation6], %s189_s10 }
  0x34   : > { %s740_s12 = scalar_lea.hbm %s1002_s25, 4096  ;;  %p1171_p8 = scmp.ne.s32.totalorder %s1167_s6, 0 }
  0x35   : > { %s1007_s5 = scalar_select %p61_p3, %s844_s17, %s63_s23  }
  0x36   : > { %p741_p7 = scmp.ne.s32.totalorder %s1002_s25, %s740_s12  ;;  %p742_p12 = pneg %p1171_p8 }
  0x37   : > { %s745_s13 = scalar_lea.hbm %s1151_s1, 8192  ;;  %p746_p2 = scmp.lt.u32.totalorder %s1002_s25, %s1151_s1 }
  0x38   : > { %p743_p13 = pnand %p742_p12, %p741_p7  ;;  %p747_p6 = scmp.lt.u32.totalorder %s745_s13, %s740_s12 }
  0x39   : > { %p749_p10 = scmp.lt.u32.totalorder %s740_s12, %s1002_s25 }
  0x3a   : > { %p744_p4 = pneg %p743_p13  ;;  %p748_p5 = por %p747_p6, %p746_p2 }
  0x3c   : > { %p750_p11 = por %p749_p10, %p748_p5 }
  0x3e   : > { %p751_p1 = pnand %p750_p11, %p744_p4 }
  0x40   : > { %754 = shalt.err (!%p751_p1)
}
  0x41   : > { %s755_s23 = scalar_lea.vmem %s1009_s11, 4096  ;;  %s859_s10 = smov [#allocation5]  }
  0x42   : > { %p756_p0 = scmp.ne.s32.totalorder %s1009_s11, %s755_s23  ;;  %s760_s30 = sshll.u32 %s859_s10, 4  ;;  %s761_s30 = int_to_ptr.vmem [resolvable:$false] %s760_s30 }
  0x43   : > { %s762_s14 = scalar_lea.vmem %s761_s30, 8192  ;;  %p763_p7 = scmp.lt.s32.totalorder %s1009_s11, %s761_s30 }
  0x44   : > { %p758_p9 = pnand %p756_p0, %p742_p12  ;;  %p764_p13 = scmp.lt.s32.totalorder %s762_s14, %s755_s23 }
  0x46   : > { %p759_p3 = pneg %p758_p9  ;;  %p765_p2 = por %p764_p13, %p763_p7 }
  0x48   : > { %p766_p6 = pnand %p765_p2, %p759_p3 }
  0x4a   : > { %769 = shalt.err (!%p766_p6)
}
  0x4b   : > { %s860_s12 = smov 256   ;;  %s861_s21 = smov 16  }
  0x4c   : > { %645 = dma.hbm_to_vmem [thread:$0]  (!%p1171_p8), %s1002_s25, 4096, %s1009_s11, %s1011_s9, %s860_s12, %s860_s12, %s861_s21  }
  0x4d   : > { %p1172_p12 = scmp.ne.s32.totalorder %s1166_s29, 0 }
  0x4e   : > { %p1173_p4 = scmp.ne.s32.totalorder (!%p1172_p12), %s1161_s24, 0 }
  0x4f   : > { %227 = sbr.rel (%p1172_p12) target bundleno = 465 (0x1d1), region = 36 }
  0x56   : > { %823 = dma.done.wait (%p1173_p4), [#allocation3], 256  }
  0x57   : > { %825 = vsyncadd (%p1173_p4), [#allocation3], 4294967040  ;;  %s1046_s13 = sand.u32 1, %s840_s16   ;;  %p1174_p8 = scmp.ne.s32.totalorder %s1163_s26, 0 }
  0x58   : > { %s586_s7 = sshll.u32 %s1046_s13, 8  ;;  %s234_s22 = scalar_lea.sflag [#allocation6], %s1046_s13 }
  0x59   : > { %s1050_s23 = scalar_lea.vmem [#allocation5], %s586_s7 }
  0x5a   : > { %827 = dma.done.wait (%p1174_p8), %s234_s22, 4096  }
  0x5b   : > { %829 = vsyncadd (%p1174_p8), %s234_s22, 4294963200  ;;  %v290_v0 = vld [vmem:[%s1050_s23 + $0x8] sm:$0xff]  ;;  %v292_v1 = vld [vmem:[%s1050_s23 + $0x18] sm:$0xff]  ;;  %p270_p5 = scmp.lt.s32.totalorder %s848_s18, 1  ;;  %s589_s10 = sshll.u32 %s848_s18, 7 }
  0x5c   : > { %v289_v2 = vld [vmem:[%s1050_s23] sm:$0xff]  ;;  %v598_v3 = vpack.c.bf16 %v292_v1, %v290_v0  ;;  %v291_v4 = vld [vmem:[%s1050_s23 + $0x10] sm:$0xff]  ;;  %v294_v5 = vld [vmem:[%s1050_s23 + $0x28] sm:$0xff]  ;;  %s433_s30 = sshra.s32 %s589_s10, 7  ;;  %s587_s14 = sshll.u32 %s1046_s13, 3 }
  0x5d   : > { %v296_v6 = vld [vmem:[%s1050_s23 + $0x38] sm:$0xff]  ;;  %v600_v7 = vpack.c.bf16 %v291_v4, %v289_v2  ;;  %v293_v9 = vld [vmem:[%s1050_s23 + $0x20] sm:$0xff]  ;;  %v295_v10 = vld [vmem:[%s1050_s23 + $0x30] sm:$0xff]  ;;  %s271_s24 = scalar_select %p270_p5, %s848_s18, 1 }
  0x5e   : > { %v602_v8 = vpack.c.bf16 %v296_v6, %v294_v5  ;;  %599 = vmatprep.subr.bf16.mxu0 %v598_v3  ;;  %v298_v11 = vld [vmem:[%s1050_s23 + $0x48] sm:$0xff]  ;;  %v300_v12 = vld [vmem:[%s1050_s23 + $0x58] sm:$0xff]  ;;  %v604_v13 = vpack.c.bf16 %v295_v10, %v293_v9  ;;  %v297_v16 = vld [vmem:[%s1050_s23 + $0x40] sm:$0xff]  ;;  %v418_v5 = vlaneseq  ;;  %s590_s12 = sshll.u32 %s433_s30, 3  ;;  %s267_s7 = scalar_lea.vmem [#allocation7], %s587_s14 }
  0x5f   : > { %601 = vmatpush1.bf16.xpose.msra.mxu0 %v600_v7  ;;  %v606_v14 = vpack.c.bf16 %v300_v12, %v298_v11  ;;  %v287_v15 = vld [vmem:[#allocation2 + $0x8] sm:$0xff]  ;;  %v299_v17 = vld [vmem:[%s1050_s23 + $0x50] sm:$0xff]  ;;  %v302_v18 = vld [vmem:[%s1050_s23 + $0x68] sm:$0xff]  ;;  %s272_s6 = scalar_lea.vmem %s1152_s2, %s271_s24  ;;  %s275_s9 = scalar_lea.vmem %s1153_s3, %s271_s24 }
  0x60   : > { %603 = vmatprep.subr.bf16.mxu0 %v602_v8  ;;  %385 = vmatprep.mubr.f32.mxu0 %v287_v15  ;;  %v304_v19 = vld [vmem:[%s1050_s23 + $0x78] sm:$0xff]  ;;  %v608_v20 = vpack.c.bf16 %v299_v17, %v297_v16  ;;  %v301_v22 = vld [vmem:[%s1050_s23 + $0x60] sm:$0xff]  ;;  %v303_v23 = vld [vmem:[%s1050_s23 + $0x70] sm:$0xff]  ;;  %v419_v6 = vshrl.u32 %v418_v5, 7  ;;  %s436_s21 = scalar_lea.vmem [#allocation2], %s590_s12  ;;  %s460_s22 = sshll.u32 %s267_s7, 4  ;;  %s1103_s22 = int_to_ptr.vmem [resolvable:$true] %s460_s22 }
  0x61   : > { %v610_v21 = vpack.c.bf16 %v304_v19, %v302_v18  ;;  %v306_v24 = vld [vmem:[%s1050_s23 + $0x88] sm:$0xff]  ;;  %v308_v25 = vld [vmem:[%s1050_s23 + $0x98] sm:$0xff]  ;;  %v612_v26 = vpack.c.bf16 %v303_v23, %v301_v22  ;;  %v305_v28 = vld [vmem:[%s1050_s23 + $0x80] sm:$0xff]  ;;  %s1101_s26 = scalar_lea.hbm %s1154_s4, %s589_s10  ;;  %s447_s18 = scalar_lea.sflag [#allocation4], %s1046_s13 }
  0x62   : > { %v614_v27 = vpack.c.bf16 %v308_v25, %v306_v24  ;;  %v307_v29 = vld [vmem:[%s1050_s23 + $0x90] sm:$0xff]  ;;  %v310_v30 = vld [vmem:[%s1050_s23 + $0xa8] sm:$0xff]  ;;  %v312_v31 = vld [vmem:[%s1050_s23 + $0xb8] sm:$0xff]  ;;  %v420_v8 = vsub.s32 0, %v419_v6  ;;  %s770_s29 = scalar_lea.vmem %s1103_s22, 128  ;;  %p1175_p11 = scmp.ne.s32.totalorder %s1164_s27, 0 }
  0x63   : > { %v616_v32 = vpack.c.bf16 %v307_v29, %v305_v28  ;;  %v618_v33 = vpack.c.bf16 %v312_v31, %v310_v30  ;;  %v309_v34 = vld [vmem:[%s1050_s23 + $0xa0] sm:$0xff]  ;;  %v311_v35 = vld [vmem:[%s1050_s23 + $0xb0] sm:$0xff]  ;;  %v314_v36 = vld [vmem:[%s1050_s23 + $0xc8] sm:$0xff]  ;;  %p771_p10 = scmp.ne.s32.totalorder %s1103_s22, %s770_s29 }
  0x64   : > { %v316_v37 = vld [vmem:[%s1050_s23 + $0xd8] sm:$0xff]  ;;  %v620_v38 = vpack.c.bf16 %v311_v35, %v309_v34  ;;  %v313_v40 = vld [vmem:[%s1050_s23 + $0xc0] sm:$0xff]  ;;  %v315_v41 = vld [vmem:[%s1050_s23 + $0xd0] sm:$0xff] }
  0x65   : > { %v622_v39 = vpack.c.bf16 %v316_v37, %v314_v36  ;;  %v318_v42 = vld [vmem:[%s1050_s23 + $0xe8] sm:$0xff]  ;;  %v320_v43 = vld [vmem:[%s1050_s23 + $0xf8] sm:$0xff]  ;;  %v624_v44 = vpack.c.bf16 %v315_v41, %v313_v40  ;;  %v317_v46 = vld [vmem:[%s1050_s23 + $0xe0] sm:$0xff]  ;;  %p772_p1 = pnand %p771_p10, %p1175_p11 }
  0x66   : > { %v626_v45 = vpack.c.bf16 %v320_v43, %v318_v42  ;;  %v319_v47 = vld [vmem:[%s1050_s23 + $0xf0] sm:$0xff] }
  0x67   : > { %605 = vmatpush1.bf16.xpose.msra.mxu0 %v604_v13  ;;  %v628_v48 = vpack.c.bf16 %v319_v47, %v317_v46  ;;  %v286_v49 = vld [vmem:[#allocation2] sm:$0xff]  ;;  %p773_p0 = pneg %p772_p1 }
  0x68   : > { %607 = vmatprep.subr.bf16.mxu0 %v606_v14  ;;  %v413_v7 = vld [vmem:[%s272_s6] sm:$0x1]  ;;  %s862_s6 = smov [#allocation7]  }
  0x69   : > { %v588_v12 = vld [vmem:[%s275_s9] ss:$0 sm:$0xff]  ;;  %s774_s25 = sshll.u32 %s862_s6, 4  ;;  %s775_s25 = int_to_ptr.vmem [resolvable:$false] %s774_s25 }
  0x6a   : > { %v437_v18 = vld [vmem:[%s436_s21] sm:$0xff]  ;;  %s776_s11 = scalar_lea.vmem %s775_s25, 256  ;;  %p777_p9 = scmp.lt.s32.totalorder %s1103_s22, %s775_s25 }
  0x6b   : > { %p778_p3 = scmp.lt.s32.totalorder %s776_s11, %s770_s29 }
  0x6d   : > { %p779_p7 = por %p778_p3, %p777_p9 }
  0x6f   : > { %609 = vmatpush1.bf16.xpose.msra.mxu0 %v608_v20  ;;  %p780_p13 = pnand %p779_p7, %p773_p0 }
  0x70   : > { %611 = vmatprep.subr.bf16.mxu0 %v610_v21 }
  0x77   : > { %613 = vmatpush1.bf16.xpose.msra.mxu0 %v612_v26 }
  0x78   : > { %615 = vmatprep.subr.bf16.mxu0 %v614_v27 }
  0x7f   : > { %617 = vmatpush1.bf16.xpose.msra.mxu0 %v616_v32 }
  0x80   : > { %619 = vmatprep.subr.bf16.mxu0 %v618_v33 }
  0x87   : > { %621 = vmatpush1.bf16.xpose.msra.mxu0 %v620_v38 }
  0x88   : > { %623 = vmatprep.subr.bf16.mxu0 %v622_v39 }
  0x8f   : > { %625 = vmatpush1.bf16.xpose.msra.mxu0 %v624_v44 }
  0x90   : > { %627 = vmatprep.subr.bf16.mxu0 %v626_v45 }
  0x97   : > { %629 = vmatpush1.bf16.xpose.msra.mxu0 %v628_v48 }
  0x9e   : > { %386 = vmatmul.mubr.f32.vlgmr.msra.gmra.mrb[0].mxu0 %v286_v49 }
 0x171   : > { %v387_v50 = vpop.f32.mrb[0].mxu0 }
 0x172   : > { %v389_v51 = vpop.f32.mrb[1].mxu0  ;;  %v397_v52 = vrot.slane %v387_v50, 4 }
 0x174   : > { %v398_v53 = vadd.f32 %v397_v52, %v387_v50 }
 0x176   : > { %v399_v54 = vrot.slane %v398_v53, 2 }
 0x178   : > { %v400_v55 = vadd.f32 %v399_v54, %v398_v53 }
 0x17a   : > { %v401_v56 = vrot.slane %v400_v55, 1 }
 0x17c   : > { %v402_v57 = vadd.f32 %v401_v56, %v400_v55 }
 0x17e   : > { %v403_v58 = vmul.f32 0.125, %v402_v57 }
 0x180   : > { %v404_v59 = vsub.f32 %v387_v50, %v403_v58 }
 0x182   : > { %v405_v60 = vmul.f32 %v404_v59, %v404_v59 }
 0x184   : > { %v406_v61 = vrot.slane %v405_v60, 4 }
 0x186   : > { %v407_v62 = vadd.f32 %v406_v61, %v405_v60 }
 0x188   : > { %v408_v63 = vrot.slane %v407_v62, 2 }
 0x18a   : > { %v409_v0 = vadd.f32 %v408_v63, %v407_v62 }
 0x18c   : > { %v410_v1 = vrot.slane %v409_v0, 1 }
 0x18e   : > { %v411_v2 = vadd.f32 %v410_v1, %v409_v0 }
 0x190   : > { %v412_v3 = vmul.f32 0.125, %v411_v2 }
 0x192   : > { %v414_v4 = vadd.f32 1e-05, %v412_v3 }
 0x194   : > { %706 = vrsqrt.f32 %v414_v4 }
 0x19e   : > { %v707_v9 = vpop.eup %706 }
 0x19f   : > { %v416_v10 = vmul.f32 %v707_v9, %v413_v7 }
 0x1a1   : > { %v421_v11 = vrot.slane %v416_v10, %v420_v8 }
 0x1a3   : > { %v423_v13 = vmul.f32 %v421_v11, %v404_v59 }
 0x1a5   : > { %v431_v14 = vadd.f32 %v588_v12, %v423_v13 }
 0x1a7   : > { %v591_v15 = vmul.f32 -1.442695, %v431_v14 }
 0x1a9   : > { %708 = vpow2.f32 %v591_v15 }
 0x1b3   : > { %v709_v16 = vpop.eup %708 }
 0x1b4   : > { %v441_v17 = vadd.f32 1.0, %v709_v16 }
 0x1b6   : > { %710 = vrcp.f32 %v441_v17 }
 0x1c0   : > { %v711_v19 = vpop.eup %710 }
 0x1c1   : > { %v444_v20 = vmul.f32 %v711_v19, %v437_v18 }
 0x1c3   : > { %445 = vst [vmem:[%s267_s7] sm:$0xff] %v444_v20 }
 0x1c4   : > { %783 = shalt.err (!%p780_p13)
}
 0x1c5   : > { %s784_s13 = scalar_lea.hbm %s1101_s26, 128  ;;  %s788_s30 = scalar_lea.hbm %s1154_s4, 256 }
 0x1c6   : > { %p785_p2 = scmp.ne.s32.totalorder %s1101_s26, %s784_s13  ;;  %p789_p4 = scmp.lt.u32.totalorder %s1101_s26, %s1154_s4 }
 0x1c7   : > { %p790_p8 = scmp.lt.u32.totalorder %s788_s30, %s784_s13  ;;  %p792_p10 = scmp.lt.u32.totalorder %s784_s13, %s1101_s26 }
 0x1c8   : > { %p786_p6 = pnand %p785_p2, %p1175_p11 }
 0x1c9   : > { %p791_p5 = por %p790_p8, %p789_p4 }
 0x1ca   : > { %p787_p12 = pneg %p786_p6 }
 0x1cb   : > { %p793_p1 = por %p792_p10, %p791_p5 }
 0x1cd   : > { %p794_p0 = pnand %p793_p1, %p787_p12 }
 0x1cf   : > { %797 = shalt.err (!%p794_p0)
}
 0x1d0   : > { %636 = dma.vmem_to_hbm [thread:$0]  (%p1175_p11), %s1103_s22, 128, %s1101_s26, %s447_s18  }
 0x1d1 PF: > { %s472_s21 = sand.u32 1, %s836_s15   ;;  %p1176_p9 = scmp.ne.s32.totalorder %s1165_s28, 0 }
 0x1d2   : > { %p1177_p3 = scmp.ge.s32.totalorder %s856_s20, 2  ;;  %s473_s7 = scalar_lea.sflag [#allocation4], %s472_s21 }
 0x1d4   : > { %p647_p7 = pnand %p1177_p3, %p1176_p9 }
 0x1d6   : > { %831 = dma.done.wait (!%p647_p7), %s473_s7, 128  }
 0x1d7   : > { %833 = vsyncadd (!%p647_p7), %s473_s7, 4294967168  ;;  %s21_s20 = sadd.s32 1, %s856_s20   ;;  %s1178_s15 = smov %s840_s16 }
 0x1d8   : > { %p18_p13 = scmp.ge.s32.totalorder %s21_s20, 4   ;;  %s1179_s16 = smov %s844_s17 }
 0x1d9   : > { %s1180_s17 = smov %s1007_s5  ;;  %s1181_s18 = smov %s852_s19 }
 0x1da   : > { %s1182_s19 = smov %s1184_s8  ;;  %20 = sbr.rel (!%p18_p13) target bundleno = 7 (0x7), region = 102 }
 0x1e1   :  { %478 = vsyncpa [#allocation3], 1 }
 0x1e2   :  { %480 = vsyncpa [#allocation3 + $0x1], 1 }
 0x1e3   :  { %481 = vsyncpa [#allocation6], 1 }
 0x1e4   :  { %483 = vsyncpa [#allocation6 + $0x1], 1 }
 0x1e5   :  { %484 = vsyncpa [#allocation4], 1 }
 0x1e6   :  { %486 = vsyncpa [#allocation4 + $0x1], 1 }

</bundles_post_ra>
